<compile_context>
chip_gen: v6e
topology: v6e:2x2x1
jax: 0.10.0
libtpu: 0.0.40
codegen_flags: <defaults>
</compile_context>

<pallas_src>
import jax
import jax.numpy as jnp
from jax.experimental import pallas as pl
from jax.experimental.pallas import tpu as pltpu

_LANE = 128


def _gap_rows_kernel(x_ref, o_ref):
    # x_ref: (TR, HW) tile in VMEM; o_ref: (TR, 1) tile in VMEM.
    tr, hw = x_ref.shape
    if hw % _LANE == 0 and hw > _LANE:
        # Stage 1: per-lane VPU accumulation over aligned 128-wide chunks.
        acc = x_ref[:, 0:_LANE].astype(jnp.float32)
        for i in range(1, hw // _LANE):
            acc = acc + x_ref[:, i * _LANE:(i + 1) * _LANE].astype(jnp.float32)
        # Stage 2: single cross-lane (XLU) reduce of the (TR, 128) partials.
        s = jnp.sum(acc, axis=-1, keepdims=True)
    else:
        # Fallback for small / unaligned spatial extents.
        s = jnp.sum(x_ref[...].astype(jnp.float32), axis=-1, keepdims=True)
    # 1/(H*W) is a trace-time constant; keep it as a folded multiply.
    o_ref[...] = (s * (1.0 / hw)).astype(o_ref.dtype)


def lambda_forward(x, *, target_tile_bytes=4 * 1024 * 1024):
    """Pallas implementation of Lambda(lambda x: x.mean(dim=[2, 3])) on NCHW."""
    n, c, h, w = x.shape
    rows = n * c
    hw = h * w
    x2 = x.reshape(rows, hw)  # contiguous NCHW reshape: no data movement.

    # Row tile: multiple of 8 sized to ~target_tile_bytes per input buffer,
    # clamped to the full row count for small inputs.
    bytes_per_row = hw * x2.dtype.itemsize
    tr = max(8, ((target_tile_bytes // max(bytes_per_row, 1)) // 8) * 8)
    if tr >= rows:
        tr = rows
    grid = (pl.cdiv(rows, tr),)

    out = pl.pallas_call(
        _gap_rows_kernel,
        out_shape=jax.ShapeDtypeStruct((rows, 1), x.dtype),
        grid=grid,
        in_specs=[pl.BlockSpec((tr, hw), lambda i: (i, 0))],
        out_specs=pl.BlockSpec((tr, 1), lambda i: (i, 0)),
        compiler_params=pltpu.CompilerParams(
            dimension_semantics=("parallel",),
            vmem_limit_bytes=32 * 1024 * 1024,
        ),
    )(x2)
    return out.reshape(n, c)


if __name__ == "__main__":
    key = jax.random.PRNGKey(0)
    # small NCHW input consistent with a conv feature map: batch=2, channels=4, 16x16
    x = jax.random.normal(key, (2, 4, 16, 16), dtype=jnp.float32)

    out = lambda_forward(x)
    jax.block_until_ready(out)

    # reference check against plain JAX (same semantics as x.mean(dim=[2,3]) in torch)
    ref = jnp.mean(x, axis=(2, 3))
    assert out.shape == (2, 4)
    assert jnp.allclose(out, ref, atol=1e-5, rtol=1e-5)

    print("KERNEL_OK")
</pallas_src>

<mosaic_0001>
module attributes {stable_mosaic.version = 11 : i64} {
  func.func @_gap_rows_kernel(%arg0: i32, %arg1: memref<8x256xf32, #tpu.memory_space<vmem>>, %arg2: memref<8x1xf32, #tpu.memory_space<vmem>>) attributes {dimension_semantics = [#tpu.dimension_semantics<parallel>], iteration_bounds = array<i64: 1>, scalar_prefetch = 0 : i64, scratch_operands = 0 : i64, tpu.core_type = #tpu.core_type<tc>, window_params = [{transform_indices = @transform_0, window_bounds = array<i64: 8, 256>}, {transform_indices = @transform_1, window_bounds = array<i64: 8, 1>}]} {
    %c0 = arith.constant 0 : index
    %c0_0 = arith.constant 0 : index
    %0 = vector.load %arg1[%c0, %c0_0] : memref<8x256xf32, #tpu.memory_space<vmem>>, vector<8x128xf32>
    %c0_1 = arith.constant 0 : index
    %c128 = arith.constant 128 : index
    %1 = vector.load %arg1[%c0_1, %c128] : memref<8x256xf32, #tpu.memory_space<vmem>>, vector<8x128xf32>
    %2 = arith.addf %0, %1 : vector<8x128xf32>
    %cst = arith.constant dense<0.000000e+00> : vector<8xf32>
    %3 = vector.multi_reduction <add>, %2, %cst [1] : vector<8x128xf32> to vector<8xf32>
    %4 = vector.shape_cast %3 : vector<8xf32> to vector<8x1xf32>
    %cst_2 = arith.constant 3.906250e-03 : f32
    %5 = vector.broadcast %cst_2 : f32 to vector<8x1xf32>
    %6 = arith.mulf %4, %5 : vector<8x1xf32>
    %c0_3 = arith.constant 0 : index
    %c0_4 = arith.constant 0 : index
    %7 = vector.load %arg2[%c0_3, %c0_4] : memref<8x1xf32, #tpu.memory_space<vmem>>, vector<8x1xf32>
    tpu.vector_store %arg2[%c0_3, %c0_4], %6 {strides = array<i32>} : memref<8x1xf32, #tpu.memory_space<vmem>>, vector<8x1xf32>,
    return
  }
  func.func @transform_0(%arg0: i32) -> (i32, i32) {
    %c0_i32 = arith.constant 0 : i32
    %c0_i32_0 = arith.constant 0 : i32
    return %arg0, %c0_i32 : i32, i32
  }
  func.func @transform_1(%arg0: i32) -> (i32, i32) {
    %c0_i32 = arith.constant 0 : i32
    %c0_i32_0 = arith.constant 0 : i32
    return %arg0, %c0_i32 : i32, i32
  }
}

</mosaic_0001>

<bundles_post_ra>
// kernel: tpu_custom_call.1
= control target key start
LH: loop header
LB: loop body
LE: loop exit
PB: predicated region body
PF: predicated region fallthrough
CT: control target
= control target key end

     0   :  { %6 = vsyncpa [#allocation3], 0  ;;  %s56_s6 = smov [#allocation2]   ;;  %s73_s0 = inlined_call_operand.hbm [shape: f32[8,256], index: 0, kind: input, shape index: {}]   ;;  %s74_s1 = inlined_call_operand.vmem [shape: f32[8,1], index: 1, kind: output, shape index: {}]  }
   0x1   :  { %s13_s7 = sshll.u32 %s56_s6, 4  ;;  %s14_s7 = int_to_ptr.vmem [resolvable:$true] %s13_s7 }
   0x2   :  { %s42_s8 = scalar_lea.vmem %s14_s7, 256  ;;  %p47_p1 = scmp.lt.s32.totalorder %s14_s7, %s14_s7 }
   0x3   :  { %p43_p0 = scmp.ne.s32.totalorder %s14_s7, %s42_s8  ;;  %p48_p2 = scmp.lt.s32.totalorder %s42_s8, %s42_s8 }
   0x5   :  { %p49_p3 = por %p48_p2, %p47_p1 }
   0x7   :  { %p50_p4 = pnand %p49_p3, %p43_p0 }
   0x9   :  { %53 = shalt.err (!%p50_p4)
}
   0xa   :  { %16 = dma.hbm_to_vmem [thread:$0]  %s73_s0, 256, %s14_s7, [#allocation3]  }
   0xb   :  { %54 = dma.done.wait [#allocation3], 256  }
   0xc   :  { %55 = vsyncadd [#allocation3], 4294967040  ;;  %v20_v0 = vld [vmem:[#allocation2] sm:$0xff]  ;;  %v21_v1 = vld [vmem:[#allocation2 + $0x8] sm:$0xff]  ;;  %vm26_vm0 = vcmask 7168  }
   0xd   :  { %v22_v2 = vadd.f32 %v21_v1, %v20_v0 }
   0xf   :  { %23 = vadd.xlane.f32.xlu0 %v22_v2 }
  0x98   :  { %v24_v3 = vpop.xlane.xlu0 %23 }
  0x99   :  { %v25_v4 = vmul.f32 0.00390625, %v24_v3 }
  0x9b   :  { %27 = vst.msk [vmem:[%s74_s1] sm:$0xff] %vm26_vm0, %v25_v4 }
  0x9c   :  { %32 = vsyncpa [#allocation3], 1 }

</bundles_post_ra>
